<compile_context>
chip_gen: v7x
topology: tpu7x:2x2x1
jax: 0.10.0
libtpu: 0.0.40
codegen_flags: <defaults>
</compile_context>

<pallas_src>
import functools

import jax
import jax.numpy as jnp
from jax import lax
from jax.experimental import pallas as pl
from jax.experimental.pallas import tpu as pltpu


def _round_up(x, m):
    return ((x + m - 1) // m) * m


# ----------------------------- Pallas kernel ------------------------------ #
def _vision_embed_kernel(patches_ref, w_ref, pos_ref, out_ref):
    # patches_ref: (1, TM, PDp)  bf16   (row 0 of each image == zeros -> cls slot)
    # w_ref      : (PDp, Hp)     bf16   zero-padded flattened conv weight
    # pos_ref    : (TM, Hp)      f32    pos embed (+cls token in row 0, +bias rows 1..)
    # out_ref    : (1, TM, Hp)
    emb = jnp.dot(patches_ref[0], w_ref[...],
                  preferred_element_type=jnp.float32)          # MXU, f32 accum
    out_ref[0] = (emb + pos_ref[...]).astype(out_ref.dtype)    # f32 epilogue


# ------------------------------- wrapper ----------------------------------- #
def vision_embedding(pixel_values, conv_w, conv_b, cls_token, pos_embed,
                     *, patch_size):
    """pixel_values: [B, 3, H, W] float32 (NCHW, like PyTorch)."""
    B, C, H, W = pixel_values.shape
    P = patch_size
    Hp, Wp = H // P, W // P
    num_patches = Hp * Wp
    hidden = conv_w.shape[0]
    patch_dim = C * P * P
    rows = num_patches + 1                      # cls slot + patches

    pd_pad = _round_up(patch_dim, 128)          # lane-align contraction dim
    h_pad = _round_up(hidden, 128)              # lane-dense output stores

    # --- glue: patchify (reshape/transpose, no compute) ---
    # TODO(synk): fuse this transpose into the pallas_call input
    # (allow_input_fusion / BlockSpec gather) to avoid one HBM round-trip.
    patches = pixel_values.reshape(B, C, Hp, P, Wp, P)
    patches = patches.transpose(0, 2, 4, 1, 3, 5)
    patches = patches.reshape(B, num_patches, patch_dim).astype(jnp.bfloat16)
    # Prepend one zero row per image (cls slot: 0 @ W == 0) and zero-pad the
    # contraction dim up to a lane multiple.  Fuses with the patchify copy.
    patches_aug = jnp.pad(patches, ((0, 0), (1, 0), (0, pd_pad - patch_dim)))

    # conv weight [hidden, C, P, P] -> [C*P*P, hidden], zero-padded, bf16.
    w2d = conv_w.reshape(hidden, patch_dim).T.astype(jnp.bfloat16)
    w2d = jnp.pad(w2d, ((0, pd_pad - patch_dim), (0, h_pad - hidden)))

    # Fold cls token into pos row 0 and the conv bias into pos rows 1..NP
    # (one-time O(NP*H) prep; removes two per-step VPU adds / the concat).
    pos2d = pos_embed.reshape(rows, hidden).astype(jnp.float32)
    pos2d = pos2d.at[0].add(cls_token.reshape(hidden).astype(jnp.float32))
    pos2d = pos2d.at[1:].add(conv_b.reshape(1, hidden).astype(jnp.float32))
    pos2d = jnp.pad(pos2d, ((0, 0), (0, h_pad - hidden)))

    # Row tiling: whole image when small (block == full dim is always legal),
    # else 256-row tiles (MXU-friendly, bounded VMEM; edge tile is masked).
    tm = rows if rows <= 256 else 256
    n_row_tiles = pl.cdiv(rows, tm)

    out_pad = pl.pallas_call(
        _vision_embed_kernel,
        out_shape=jax.ShapeDtypeStruct((B, rows, h_pad), pixel_values.dtype),
        grid=(B, n_row_tiles),
        in_specs=[
            pl.BlockSpec((1, tm, pd_pad), lambda b, t: (b, t, 0)),
            pl.BlockSpec((pd_pad, h_pad), lambda b, t: (0, 0)),
            pl.BlockSpec((tm, h_pad), lambda b, t: (t, 0)),
        ],
        out_specs=pl.BlockSpec((1, tm, h_pad), lambda b, t: (b, t, 0)),
        compiler_params=pltpu.CompilerParams(
            dimension_semantics=("parallel", "parallel")),
    )(patches_aug, w2d, pos2d)

    if h_pad != hidden:
        out_pad = out_pad[:, :, :hidden]
    return out_pad


# ------------------------------ reference ---------------------------------- #
def _reference(pixel_values, conv_w, conv_b, cls_token, pos_embed, *, patch_size):
    B = pixel_values.shape[0]
    hidden = conv_w.shape[0]
    # NCHW conv, kernel=stride=patch_size, OIHW weights (pure f32).
    x = lax.conv_general_dilated(
        pixel_values, conv_w,
        window_strides=(patch_size, patch_size),
        padding="VALID",
        dimension_numbers=("NCHW", "OIHW", "NCHW"),
    ) + conv_b.reshape(1, hidden, 1, 1)
    x = x.reshape(B, hidden, -1).transpose(0, 2, 1)            # [B, NP, H]
    cls = jnp.broadcast_to(cls_token, (B, 1, hidden))
    x = jnp.concatenate([cls, x], axis=1)
    return x + pos_embed


# --------------------------------- main ------------------------------------ #
if __name__ == "__main__":
    # Small config consistent with the module: hidden=32, image=16, patch=4.
    hidden_size = 32
    image_size = 16
    patch_size = 4
    num_patches = (image_size // patch_size) ** 2
    B = 2

    key = jax.random.PRNGKey(0)
    k_x, k_w, k_b, k_cls, k_pos = jax.random.split(key, 5)

    pixel_values = jax.random.normal(k_x, (B, 3, image_size, image_size),
                                     dtype=jnp.float32)
    conv_w = jax.random.normal(k_w, (hidden_size, 3, patch_size, patch_size),
                               dtype=jnp.float32) * 0.02
    conv_b = jax.random.normal(k_b, (hidden_size,), dtype=jnp.float32) * 0.02
    cls_token = jnp.clip(
        jax.random.normal(k_cls, (1, 1, hidden_size), dtype=jnp.float32) * 0.02,
        -0.04, 0.04)
    pos_embed = jnp.clip(
        jax.random.normal(k_pos, (1, num_patches + 1, hidden_size),
                          dtype=jnp.float32) * 0.02,
        -0.04, 0.04)

    fn = jax.jit(functools.partial(vision_embedding, patch_size=patch_size))
    out = fn(pixel_values, conv_w, conv_b, cls_token, pos_embed)
    out = jax.block_until_ready(out)

    ref = _reference(pixel_values, conv_w, conv_b, cls_token, pos_embed,
                     patch_size=patch_size)
    assert out.shape == (B, num_patches + 1, hidden_size), out.shape
    # bf16 matmul operands (f32 accumulation) -> slightly looser tolerance
    # than a pure-f32 comparison.
    assert jnp.allclose(out, ref, atol=2e-2, rtol=2e-2), "mismatch vs reference"

    print("KERNEL_OK")
</pallas_src>

<mosaic_0001>
module attributes {stable_mosaic.version = 11 : i64} {
  func.func @_vision_embed_kernel(%arg0: i32, %arg1: i32, %arg2: memref<1x17x128xbf16, #tpu.memory_space<vmem>>, %arg3: memref<128x128xbf16, #tpu.memory_space<vmem>>, %arg4: memref<17x128xf32, #tpu.memory_space<vmem>>, %arg5: memref<1x17x128xf32, #tpu.memory_space<vmem>>) attributes {dimension_semantics = [#tpu.dimension_semantics<parallel>, #tpu.dimension_semantics<parallel>], iteration_bounds = array<i64: 2, 1>, scalar_prefetch = 0 : i64, scratch_operands = 0 : i64, tpu.core_type = #tpu.core_type<tc>, window_params = [{transform_indices = @transform_0, window_bounds = array<i64: 1, 17, 128>}, {pipeline_mode = #tpu.pipeline_mode<synchronous>, transform_indices = @transform_1, window_bounds = array<i64: 128, 128>}, {transform_indices = @transform_2, window_bounds = array<i64: 17, 128>}, {transform_indices = @transform_3, window_bounds = array<i64: 1, 17, 128>}]} {
    %c0 = arith.constant 0 : index
    %c0_0 = arith.constant 0 : index
    %c0_1 = arith.constant 0 : index
    %0 = vector.load %arg2[%c0, %c0_0, %c0_1] : memref<1x17x128xbf16, #tpu.memory_space<vmem>>, vector<1x17x128xbf16>
    %1 = vector.shape_cast %0 : vector<1x17x128xbf16> to vector<17x128xbf16>
    %c0_2 = arith.constant 0 : index
    %c0_3 = arith.constant 0 : index
    %2 = vector.load %arg3[%c0_2, %c0_3] : memref<128x128xbf16, #tpu.memory_space<vmem>>, vector<128x128xbf16>
    %cst = arith.constant dense<0.000000e+00> : vector<17x128xf32>
    %3 = tpu.matmul %1, %2, %cst {dimension_numbers = #tpu.dot_dimension_numbers<[1], [0], [0], [1], [0, 0, 1, 1], [], []>} : vector<17x128xbf16>, vector<128x128xbf16>, vector<17x128xf32> -> vector<17x128xf32>
    %c0_4 = arith.constant 0 : index
    %c0_5 = arith.constant 0 : index
    %4 = vector.load %arg4[%c0_4, %c0_5] : memref<17x128xf32, #tpu.memory_space<vmem>>, vector<17x128xf32>
    %5 = arith.addf %3, %4 : vector<17x128xf32>
    %c0_6 = arith.constant 0 : index
    %c0_7 = arith.constant 0 : index
    %c0_8 = arith.constant 0 : index
    %6 = vector.load %arg5[%c0_6, %c0_7, %c0_8] : memref<1x17x128xf32, #tpu.memory_space<vmem>>, vector<1x17x128xf32>
    %7 = vector.shape_cast %6 : vector<1x17x128xf32> to vector<17x128xf32>
    %8 = vector.shape_cast %5 : vector<17x128xf32> to vector<1x17x128xf32>
    tpu.vector_store %arg5[%c0_6, %c0_7, %c0_8], %8 {strides = array<i32>} : memref<1x17x128xf32, #tpu.memory_space<vmem>>, vector<1x17x128xf32>,
    return
  }
  func.func @transform_0(%arg0: i32, %arg1: i32) -> (i32, i32, i32) {
    %c0_i32 = arith.constant 0 : i32
    %c0_i32_0 = arith.constant 0 : i32
    return %arg0, %arg1, %c0_i32 : i32, i32, i32
  }
  func.func @transform_1(%arg0: i32, %arg1: i32) -> (i32, i32) {
    %c0_i32 = arith.constant 0 : i32
    %c0_i32_0 = arith.constant 0 : i32
    %c0_i32_1 = arith.constant 0 : i32
    return %c0_i32, %c0_i32_0 : i32, i32
  }
  func.func @transform_2(%arg0: i32, %arg1: i32) -> (i32, i32) {
    %c0_i32 = arith.constant 0 : i32
    %c0_i32_0 = arith.constant 0 : i32
    return %arg1, %c0_i32 : i32, i32
  }
  func.func @transform_3(%arg0: i32, %arg1: i32) -> (i32, i32, i32) {
    %c0_i32 = arith.constant 0 : i32
    %c0_i32_0 = arith.constant 0 : i32
    return %arg0, %arg1, %c0_i32 : i32, i32, i32
  }
}

</mosaic_0001>

<bundles_post_ra>
// kernel: vision_embedding.1
= control target key start
LH: loop header
LB: loop body
LE: loop exit
PB: predicated region body
PF: predicated region fallthrough
CT: control target
= control target key end

     0   :  { %s596_s12 = smov 0   ;;  %s598_s13 = smov 0   ;;  %s666_s0 = inlined_call_operand.vmem [shape: bf16[2,17,128], index: 0, kind: input, shape index: {}]   ;;  %s667_s1 = inlined_call_operand.vmem [shape: bf16[128,128], index: 1, kind: input, shape index: {}]   ;;  %s668_s2 = inlined_call_operand.vmem [shape: f32[17,128], index: 2, kind: input, shape index: {}]   ;;  %s669_s3 = inlined_call_operand.vmem [shape: f32[2,17,128], index: 3, kind: output, shape index: {}]  }
   0x1   :  { %s600_s14 = smov 0  }
   0x2 LB: > { %s25_s15 = sadd.s32 1, %s570_s13  ;;  %p471_p0 = scmp.ge.s32.totalorder %s574_s14, 1  ;;  %s574_s14 = sphi %s600_s14, %s13_s14   ;;  %s570_s13 = sphi %s598_s13, %s671_s13   ;;  %s566_s12 = sphi %s596_s12, %s670_s12  }
   0x3   : > { %p27_p1 = scmp.ge.s32.totalorder %s25_s15, 2  ;;  %p169_p2 = scmp.lt.s32.totalorder %s574_s14, 3 }
   0x5   : > { %s673_s15 = smov (%p27_p1, %s25_s15), 0  ;;  %p170_p3 = pnand %p471_p0, %p169_p2 }
   0x6   : > { %v542_v0 = vld [vmem:[%s667_s1] sm:$0xff] (!%p170_p3)   ;;  %p207_p4 = scmp.lt.s32.totalorder (!%p170_p3), %s566_s12, 1  ;;  %v543_v1 = vld [vmem:[%s667_s1 + $0x8] sm:$0xff] (!%p170_p3)   ;;  %v544_v2 = vld [vmem:[%s667_s1 + $0x10] sm:$0xff] (!%p170_p3)  }
   0x7   : > { %173 = sbr.rel (%p170_p3) target bundleno = 257 (0x101), region = 32  ;;  %496 = vmatprep.subr.bf16.mxu0 (!%p170_p3), %v542_v0  ;;  %v545_v3 = vld [vmem:[%s667_s1 + $0x18] sm:$0xff] (!%p170_p3)   ;;  %v546_v5 = vld [vmem:[%s667_s1 + $0x20] sm:$0xff] (!%p170_p3)   ;;  %v547_v6 = vld [vmem:[%s667_s1 + $0x28] sm:$0xff] (!%p170_p3)  }
   0x8   : > { %497 = vmatpush3.bf16.msra.mxu0 (!%p170_p3), %v542_v0  ;;  %v548_v7 = vld [vmem:[%s667_s1 + $0x30] sm:$0xff] (!%p170_p3)   ;;  %v549_v8 = vld [vmem:[%s667_s1 + $0x38] sm:$0xff] (!%p170_p3)   ;;  %v252_v11 = vld [vmem:[%s668_s2] sm:$0xff] (!%p170_p3) }
   0x9   : > { %498 = vmatprep.subr.bf16.mxu0 (!%p170_p3), %v543_v1  ;;  %v254_v10 = vld [vmem:[%s668_s2 + $0x10] sm:$0x1] (!%p170_p3)  ;;  %v253_v15 = vld [vmem:[%s668_s2 + $0x8] sm:$0xff] (!%p170_p3) }
   0xc   : > { %499 = vmatpush3.bf16.msra.mxu0 (!%p170_p3), %v543_v1 }
   0xd   : > { %500 = vmatprep.subr.bf16.mxu0 (!%p170_p3), %v544_v2 }
   0xe   : > { %s675_s12 = smov (!%p207_p4, %s566_s12), 1 }
   0xf   : > { %s516_s22 = smul.u32 12, %s675_s12 }
  0x10   : > { %501 = vmatpush3.bf16.msra.mxu0 %v544_v2  ;;  %s517_s9 = smul.u32 24, %s675_s12 }
  0x11   : > { %s214_s25 = scalar_lea.vmem %s666_s0, %s516_s22  ;;  %502 = vmatprep.subr.bf16.mxu0 %v545_v3 }
  0x12   : > { %v550_v4 = vld [vmem:[%s214_s25] sm:$0xff]   ;;  %v551_v9 = vld [vmem:[%s214_s25 + $0x8] ss:$0 sps:$4 sm:$0x11]   ;;  %s230_s20 = scalar_lea.vmem %s669_s3, %s517_s9 }
  0x13   : > { %512 = vmatprep.mubr.bf16.mxu0 %v550_v4 }
  0x14   : > { %503 = vmatpush3.bf16.msra.mxu0 %v545_v3 }
  0x15   : > { %504 = vmatprep.subr.bf16.mxu0 %v546_v5 }
  0x18   : > { %505 = vmatpush3.bf16.msra.mxu0 %v546_v5 }
  0x19   : > { %506 = vmatprep.subr.bf16.mxu0 %v547_v6 }
  0x1c   : > { %507 = vmatpush3.bf16.msra.mxu0 %v547_v6 }
  0x1d   : > { %508 = vmatprep.subr.bf16.mxu0 %v548_v7 }
  0x20   : > { %509 = vmatpush3.bf16.msra.mxu0 %v548_v7 }
  0x21   : > { %510 = vmatprep.subr.bf16.mxu0 %v549_v8 }
  0x24   : > { %511 = vmatpush3.bf16.msra.mxu0 %v549_v8 }
  0x27   : > { %513 = vmatmul.mubr.bf16.vlgmr.msra.gmra.mrb[0].mxu0 %v551_v9 }
  0xfa   : > { %v514_v12 = vpop.f32.mrb[0].mxu0 }
  0xfb   : > { %v356_v13 = vadd.f32 %v514_v12, %v254_v10  ;;  %v347_v14 = vpop.f32.mrb[1].mxu0 }
  0xfc   : > { %v348_v16 = vadd.f32 %v347_v14, %v252_v11  ;;  %v515_v17 = vpop.f32.mrb[2].mxu0 }
  0xfd   : > { %363 = vst [vmem:[%s230_s20 + $0x10] sm:$0x1] %v356_v13  ;;  %v350_v18 = vpop.f32.mrb[3].mxu0 }
  0xfe   : > { %361 = vst [vmem:[%s230_s20] sm:$0xff] %v348_v16  ;;  %v351_v19 = vadd.f32 %v350_v18, %v253_v15 }
 0x100   : > { %362 = vst [vmem:[%s230_s20 + $0x8] sm:$0xff] %v351_v19 }
 0x101 PF: > { %s13_s14 = sadd.s32 1, %s574_s14   ;;  %s670_s12 = smov %s570_s13 }
 0x102   : > { %p10_p5 = scmp.ge.s32.totalorder %s13_s14, 4   ;;  %s671_s13 = smov %s673_s15 }
 0x104   :  { %12 = sbr.rel (!%p10_p5) target bundleno = 2 (0x2), region = 65 }

</bundles_post_ra>
